<compile_context>
chip_gen: v7x
topology: tpu7x:2x2x1
jax: 0.10.0
libtpu: 0.0.40
codegen_flags: <defaults>
</compile_context>

<pallas_src>
import functools
import math

import jax
import jax.numpy as jnp
from jax.experimental import pallas as pl
from jax.experimental.pallas import tpu as pltpu

_MASK_MIN = -1e30  # finite stand-in for -inf: avoids exp/softmax NaNs


def _flash_attn_kernel(q_ref, k_ref, v_ref, mask_ref, o_ref,
                       q_bf16, m_sc, l_sc, acc_sc, *, scale):
    """One (batch, q_tile, kv_tile) grid step.  Batch dim is squeezed.

    Tiles:   q_ref (tq, D) f32 | k_ref, v_ref (tk, D) bf16
             mask_ref (tq, tk) bf16 | o_ref (tq, D)
    Scratch: q_bf16 (tq, D) bf16 | m_sc, l_sc (tq, 1) f32 | acc_sc (tq, D) f32
    """
    ki = pl.program_id(2)

    @pl.when(ki == 0)
    def _init():
        # Hoisted out of the kv loop: scale + cast q once per q tile.
        q_bf16[...] = (q_ref[...] * scale).astype(jnp.bfloat16)
        m_sc[...] = jnp.full(m_sc.shape, _MASK_MIN, dtype=m_sc.dtype)
        l_sc[...] = jnp.zeros(l_sc.shape, dtype=l_sc.dtype)
        acc_sc[...] = jnp.zeros(acc_sc.shape, dtype=acc_sc.dtype)

    # NT contraction: contract the feature dims directly -- no k transpose.
    s = jax.lax.dot_general(
        q_bf16[...], k_ref[...],
        dimension_numbers=(((1,), (1,)), ((), ())),
        preferred_element_type=jnp.float32)              # (tq, tk) f32
    s = s + mask_ref[...].astype(jnp.float32)

    # Online (flash) softmax update.
    m_prev = m_sc[...]
    m_new = jnp.maximum(m_prev, jnp.max(s, axis=-1, keepdims=True))
    alpha = jnp.exp(m_prev - m_new)
    p = jnp.exp(s - m_new)                               # (tq, tk) f32
    l_sc[...] = alpha * l_sc[...] + jnp.sum(p, axis=-1, keepdims=True)
    acc_sc[...] = alpha * acc_sc[...] + jnp.dot(
        p.astype(jnp.bfloat16), v_ref[...],
        preferred_element_type=jnp.float32)              # (tq, D) f32
    m_sc[...] = m_new

    @pl.when(ki == pl.num_programs(2) - 1)
    def _finalize():
        inv_l = pl.reciprocal(l_sc[...], approx=True)    # EUP, off the VALU path
        o_ref[...] = (acc_sc[...] * inv_l).astype(o_ref.dtype)


def _choose_tile(dim, pref):
    """Pick an MXU/HBM-friendly tile and the (possibly padded) extent."""
    if dim <= pref:
        return dim, dim                        # small dim: one whole block
    for cand in (pref, 512, 256, 128):         # prefer 256-multiples (v6e/v7x MXU)
        if cand <= pref and dim % cand == 0:
            return cand, dim
    # Ragged tail: pad up to a tile multiple.  Never fall back to a whole-S
    # block -- a (S, S) f32 mask tile OOMs v7x's 64 MiB VMEM for large S.
    tile = min(pref, 512)
    return tile, ((dim + tile - 1) // tile) * tile


def self_attention2(q, k, v, mask, hidden_dim, *, block_q=512, block_kv=512):
    """q, k, v: (B, S, D); mask: (B, S, S) additive.  Returns (B, S, D)."""
    B, S, D = q.shape
    assert k.shape == (B, S, D) and v.shape == (B, S, D)
    assert mask.shape == (B, S, S)
    out_dtype = q.dtype

    tq, Sq = _choose_tile(S, block_q)
    tk, Sk = _choose_tile(S, block_kv)

    # Halve the re-streamed K/V and the S^2 mask HBM traffic; clamp -inf mask
    # entries to a large finite negative so fully-masked rows don't NaN.
    k = k.astype(jnp.bfloat16)
    v = v.astype(jnp.bfloat16)
    mask = jnp.maximum(mask, _MASK_MIN)

    if Sq != S or Sk != S:
        q = jnp.pad(q, ((0, 0), (0, Sq - S), (0, 0)))
        k = jnp.pad(k, ((0, 0), (0, Sk - S), (0, 0)))
        v = jnp.pad(v, ((0, 0), (0, Sk - S), (0, 0)))
        # Padded kv columns are masked out; padded q rows are trimmed below.
        mask = jnp.pad(mask, ((0, 0), (0, Sq - S), (0, Sk - S)),
                       constant_values=_MASK_MIN)
    mask = mask.astype(jnp.bfloat16)

    grid = (B, Sq // tq, Sk // tk)   # two parallel axes -> both v7x TCs busy
    scale = 1.0 / math.sqrt(float(hidden_dim))
    kernel = functools.partial(_flash_attn_kernel, scale=scale)

    # TODO(synk): for D < 128 the output / accumulator are not lane-dense
    # (masked partial stores); real configs should keep D >= 128 or fold
    # heads/batch into the last dim.
    out = pl.pallas_call(
        kernel,
        out_shape=jax.ShapeDtypeStruct((B, Sq, D), out_dtype),
        grid_spec=pltpu.PrefetchScalarGridSpec(
            num_scalar_prefetch=0,
            grid=grid,
            in_specs=[
                pl.BlockSpec((pl.Squeezed(), tq, D), lambda b, qi, ki: (b, qi, 0)),
                pl.BlockSpec((pl.Squeezed(), tk, D), lambda b, qi, ki: (b, ki, 0)),
                pl.BlockSpec((pl.Squeezed(), tk, D), lambda b, qi, ki: (b, ki, 0)),
                pl.BlockSpec((pl.Squeezed(), tq, tk), lambda b, qi, ki: (b, qi, ki)),
            ],
            out_specs=pl.BlockSpec((pl.Squeezed(), tq, D),
                                   lambda b, qi, ki: (b, qi, 0)),
            scratch_shapes=[
                pltpu.VMEM((tq, D), jnp.bfloat16),   # scaled q (reused over kv)
                pltpu.VMEM((tq, 1), jnp.float32),    # running max
                pltpu.VMEM((tq, 1), jnp.float32),    # running denominator
                pltpu.VMEM((tq, D), jnp.float32),    # output accumulator
            ],
        ),
        compiler_params=pltpu.CompilerParams(
            dimension_semantics=("parallel", "parallel", "arbitrary")),
        # Working set at tq=tk=512 (bf16 K/V/mask, double-buffered) is well
        # under the scoped-VMEM defaults on v5e/v6e/v7x; no vmem_limit_bytes
        # override needed.
    )(q, k, v, mask)

    if Sq != S:
        out = out[:, :S, :]
    return out


def reference_attention(q, k, v, mask, hidden_dim):
    scores = jnp.einsum("bqd,bkd->bqk", q, k) / jnp.sqrt(jnp.float32(hidden_dim))
    weights = jax.nn.softmax(scores + mask, axis=-1)
    return jnp.einsum("bqk,bkd->bqd", weights, v)


if __name__ == "__main__":
    # Small deterministic shapes: batch=2, seq=8, hidden_dim=32.
    B, S, D = 2, 8, 32
    hidden_dim = D
    key = jax.random.PRNGKey(0)
    kq, kk, kv_, km, kw1, kw2, kw3 = jax.random.split(key, 7)

    q = jax.random.normal(kq, (B, S, D), dtype=jnp.float32)
    k = jax.random.normal(kk, (B, S, D), dtype=jnp.float32)
    v = jax.random.normal(kv_, (B, S, D), dtype=jnp.float32)
    mask = jax.random.normal(km, (B, S, S), dtype=jnp.float32)

    # Parameters declared in the module's __init__ (never applied in forward,
    # kept only for shape fidelity): q/k/v Linear(D -> hidden_dim, bias=False).
    w_query = jax.random.normal(kw1, (hidden_dim, D), dtype=jnp.float32) * 0.02
    w_key = jax.random.normal(kw2, (hidden_dim, D), dtype=jnp.float32) * 0.02
    w_value = jax.random.normal(kw3, (hidden_dim, D), dtype=jnp.float32) * 0.02
    del w_query, w_key, w_value  # forward() never uses them

    out = self_attention2(q, k, v, mask, hidden_dim)
    out = jax.block_until_ready(out)

    ref = reference_attention(q, k, v, mask, hidden_dim)
    assert out.shape == (B, S, D)
    # bf16 MXU inputs / bf16 mask + approx reciprocal -> looser tolerance.
    assert jnp.allclose(out, ref, atol=5e-2, rtol=5e-2), "mismatch vs reference"
    print("KERNEL_OK")
</pallas_src>

<mosaic_0001>
module attributes {stable_mosaic.version = 11 : i64} {
  func.func @_flash_attn_kernel(%arg0: i32, %arg1: i32, %arg2: i32, %arg3: memref<1x8x32xf32, #tpu.memory_space<vmem>>, %arg4: memref<1x8x32xbf16, #tpu.memory_space<vmem>>, %arg5: memref<1x8x32xbf16, #tpu.memory_space<vmem>>, %arg6: memref<1x8x8xbf16, #tpu.memory_space<vmem>>, %arg7: memref<1x8x32xf32, #tpu.memory_space<vmem>>, %arg8: memref<8x32xbf16, #tpu.memory_space<vmem>>, %arg9: memref<8x1xf32, #tpu.memory_space<vmem>>, %arg10: memref<8x1xf32, #tpu.memory_space<vmem>>, %arg11: memref<8x32xf32, #tpu.memory_space<vmem>>) attributes {dimension_semantics = [#tpu.dimension_semantics<parallel>, #tpu.dimension_semantics<parallel>, #tpu.dimension_semantics<arbitrary>], iteration_bounds = array<i64: 2, 1, 1>, scalar_prefetch = 0 : i64, scratch_operands = 4 : i64, tpu.core_type = #tpu.core_type<tc>, window_params = [{transform_indices = @transform_0, window_bounds = array<i64: 1, 8, 32>}, {transform_indices = @transform_1, window_bounds = array<i64: 1, 8, 32>}, {transform_indices = @transform_2, window_bounds = array<i64: 1, 8, 32>}, {transform_indices = @transform_3, window_bounds = array<i64: 1, 8, 8>}, {transform_indices = @transform_4, window_bounds = array<i64: 1, 8, 32>}]} {
    %c0_i32 = arith.constant 0 : i32
    %0 = arith.cmpi eq, %arg2, %c0_i32 : i32
    %1 = arith.extui %0 : i1 to i32
    %c0_i32_0 = arith.constant 0 : i32
    %2 = arith.cmpi ne, %1, %c0_i32_0 : i32
    scf.if %2 {
      %c0_28 = arith.constant 0 : index
      %c0_29 = arith.constant 0 : index
      %c0_30 = arith.constant 0 : index
      %39 = vector.load %arg3[%c0_28, %c0_29, %c0_30] : memref<1x8x32xf32, #tpu.memory_space<vmem>>, vector<1x8x32xf32>
      %40 = vector.shape_cast %39 : vector<1x8x32xf32> to vector<8x32xf32>
      %cst_31 = arith.constant 0.176776692 : f32
      %41 = vector.broadcast %cst_31 : f32 to vector<8x32xf32>
      %42 = arith.mulf %40, %41 : vector<8x32xf32>
      %43 = arith.truncf %42 : vector<8x32xf32> to vector<8x32xbf16>
      %c0_32 = arith.constant 0 : index
      %c0_33 = arith.constant 0 : index
      %44 = vector.load %arg8[%c0_32, %c0_33] : memref<8x32xbf16, #tpu.memory_space<vmem>>, vector<8x32xbf16>
      tpu.vector_store %arg8[%c0_32, %c0_33], %43 {strides = array<i32>} : memref<8x32xbf16, #tpu.memory_space<vmem>>, vector<8x32xbf16>,
      %cst_34 = arith.constant -1.000000e+30 : f32
      %45 = vector.broadcast %cst_34 : f32 to vector<8x1xf32>
      %c0_35 = arith.constant 0 : index
      %c0_36 = arith.constant 0 : index
      %46 = vector.load %arg9[%c0_35, %c0_36] : memref<8x1xf32, #tpu.memory_space<vmem>>, vector<8x1xf32>
      tpu.vector_store %arg9[%c0_35, %c0_36], %45 {strides = array<i32>} : memref<8x1xf32, #tpu.memory_space<vmem>>, vector<8x1xf32>,
      %cst_37 = arith.constant 0.000000e+00 : f32
      %47 = vector.broadcast %cst_37 : f32 to vector<8x1xf32>
      %c0_38 = arith.constant 0 : index
      %c0_39 = arith.constant 0 : index
      %48 = vector.load %arg10[%c0_38, %c0_39] : memref<8x1xf32, #tpu.memory_space<vmem>>, vector<8x1xf32>
      tpu.vector_store %arg10[%c0_38, %c0_39], %47 {strides = array<i32>} : memref<8x1xf32, #tpu.memory_space<vmem>>, vector<8x1xf32>,
      %cst_40 = arith.constant 0.000000e+00 : f32
      %49 = vector.broadcast %cst_40 : f32 to vector<8x32xf32>
      %c0_41 = arith.constant 0 : index
      %c0_42 = arith.constant 0 : index
      %50 = vector.load %arg11[%c0_41, %c0_42] : memref<8x32xf32, #tpu.memory_space<vmem>>, vector<8x32xf32>
      tpu.vector_store %arg11[%c0_41, %c0_42], %49 {strides = array<i32>} : memref<8x32xf32, #tpu.memory_space<vmem>>, vector<8x32xf32>,
    } else {
    }
    %c0 = arith.constant 0 : index
    %c0_1 = arith.constant 0 : index
    %3 = vector.load %arg8[%c0, %c0_1] : memref<8x32xbf16, #tpu.memory_space<vmem>>, vector<8x32xbf16>
    %c0_2 = arith.constant 0 : index
    %c0_3 = arith.constant 0 : index
    %c0_4 = arith.constant 0 : index
    %4 = vector.load %arg4[%c0_2, %c0_3, %c0_4] : memref<1x8x32xbf16, #tpu.memory_space<vmem>>, vector<1x8x32xbf16>
    %5 = vector.shape_cast %4 : vector<1x8x32xbf16> to vector<8x32xbf16>
    %cst = arith.constant dense<0.000000e+00> : vector<8x8xf32>
    %6 = tpu.matmul %3, %5, %cst {dimension_numbers = #tpu.dot_dimension_numbers<[1], [1], [0], [0], [0, 0, 1, 0], [], []>} : vector<8x32xbf16>, vector<8x32xbf16>, vector<8x8xf32> -> vector<8x8xf32>
    %c0_5 = arith.constant 0 : index
    %c0_6 = arith.constant 0 : index
    %c0_7 = arith.constant 0 : index
    %7 = vector.load %arg6[%c0_5, %c0_6, %c0_7] : memref<1x8x8xbf16, #tpu.memory_space<vmem>>, vector<1x8x8xbf16>
    %8 = vector.shape_cast %7 : vector<1x8x8xbf16> to vector<8x8xbf16>
    %9 = arith.extf %8 : vector<8x8xbf16> to vector<8x8xf32>
    %10 = arith.addf %6, %9 : vector<8x8xf32>
    %c0_8 = arith.constant 0 : index
    %c0_9 = arith.constant 0 : index
    %11 = vector.load %arg9[%c0_8, %c0_9] : memref<8x1xf32, #tpu.memory_space<vmem>>, vector<8x1xf32>
    %cst_10 = arith.constant dense<0xFF800000> : vector<8xf32>
    %12 = vector.multi_reduction <maximumf>, %10, %cst_10 [1] : vector<8x8xf32> to vector<8xf32>
    %13 = vector.shape_cast %12 : vector<8xf32> to vector<8x1xf32>
    %14 = arith.maximumf %11, %13 : vector<8x1xf32>
    %15 = arith.subf %11, %14 : vector<8x1xf32>
    %16 = math.exp %15 : vector<8x1xf32>
    %17 = vector.broadcast %14 : vector<8x1xf32> to vector<8x8xf32>
    %18 = arith.subf %10, %17 : vector<8x8xf32>
    %19 = math.exp %18 : vector<8x8xf32>
    %c0_11 = arith.constant 0 : index
    %c0_12 = arith.constant 0 : index
    %20 = vector.load %arg10[%c0_11, %c0_12] : memref<8x1xf32, #tpu.memory_space<vmem>>, vector<8x1xf32>
    %21 = arith.mulf %16, %20 : vector<8x1xf32>
    %cst_13 = arith.constant dense<0.000000e+00> : vector<8xf32>
    %22 = vector.multi_reduction <add>, %19, %cst_13 [1] : vector<8x8xf32> to vector<8xf32>
    %23 = vector.shape_cast %22 : vector<8xf32> to vector<8x1xf32>
    %24 = arith.addf %21, %23 : vector<8x1xf32>
    %c0_14 = arith.constant 0 : index
    %c0_15 = arith.constant 0 : index
    %25 = vector.load %arg10[%c0_14, %c0_15] : memref<8x1xf32, #tpu.memory_space<vmem>>, vector<8x1xf32>
    tpu.vector_store %arg10[%c0_14, %c0_15], %24 {strides = array<i32>} : memref<8x1xf32, #tpu.memory_space<vmem>>, vector<8x1xf32>,
    %c0_16 = arith.constant 0 : index
    %c0_17 = arith.constant 0 : index
    %26 = vector.load %arg11[%c0_16, %c0_17] : memref<8x32xf32, #tpu.memory_space<vmem>>, vector<8x32xf32>
    %27 = vector.broadcast %16 : vector<8x1xf32> to vector<8x32xf32>
    %28 = arith.mulf %27, %26 : vector<8x32xf32>
    %29 = arith.truncf %19 : vector<8x8xf32> to vector<8x8xbf16>
    %c0_18 = arith.constant 0 : index
    %c0_19 = arith.constant 0 : index
    %c0_20 = arith.constant 0 : index
    %30 = vector.load %arg5[%c0_18, %c0_19, %c0_20] : memref<1x8x32xbf16, #tpu.memory_space<vmem>>, vector<1x8x32xbf16>
    %31 = vector.shape_cast %30 : vector<1x8x32xbf16> to vector<8x32xbf16>
    %cst_21 = arith.constant dense<0.000000e+00> : vector<8x32xf32>
    %32 = tpu.matmul %29, %31, %cst_21 {dimension_numbers = #tpu.dot_dimension_numbers<[1], [0], [0], [1], [0, 0, 1, 1], [], []>} : vector<8x8xbf16>, vector<8x32xbf16>, vector<8x32xf32> -> vector<8x32xf32>
    %33 = arith.addf %28, %32 : vector<8x32xf32>
    %c0_22 = arith.constant 0 : index
    %c0_23 = arith.constant 0 : index
    %34 = vector.load %arg11[%c0_22, %c0_23] : memref<8x32xf32, #tpu.memory_space<vmem>>, vector<8x32xf32>
    tpu.vector_store %arg11[%c0_22, %c0_23], %33 {strides = array<i32>} : memref<8x32xf32, #tpu.memory_space<vmem>>, vector<8x32xf32>,
    %c0_24 = arith.constant 0 : index
    %c0_25 = arith.constant 0 : index
    %35 = vector.load %arg9[%c0_24, %c0_25] : memref<8x1xf32, #tpu.memory_space<vmem>>, vector<8x1xf32>
    tpu.vector_store %arg9[%c0_24, %c0_25], %14 {strides = array<i32>} : memref<8x1xf32, #tpu.memory_space<vmem>>, vector<8x1xf32>,
    %c0_i32_26 = arith.constant 0 : i32
    %36 = arith.cmpi eq, %arg2, %c0_i32_26 : i32
    %37 = arith.extui %36 : i1 to i32
    %c0_i32_27 = arith.constant 0 : i32
    %38 = arith.cmpi ne, %37, %c0_i32_27 : i32
    scf.if %38 {
      %c0_28 = arith.constant 0 : index
      %c0_29 = arith.constant 0 : index
      %39 = vector.load %arg10[%c0_28, %c0_29] : memref<8x1xf32, #tpu.memory_space<vmem>>, vector<8x1xf32>
      %40 = tpu.reciprocal %39 {approx = true} : vector<8x1xf32> -> vector<8x1xf32>
      %c0_30 = arith.constant 0 : index
      %c0_31 = arith.constant 0 : index
      %41 = vector.load %arg11[%c0_30, %c0_31] : memref<8x32xf32, #tpu.memory_space<vmem>>, vector<8x32xf32>
      %42 = vector.broadcast %40 : vector<8x1xf32> to vector<8x32xf32>
      %43 = arith.mulf %41, %42 : vector<8x32xf32>
      %c0_32 = arith.constant 0 : index
      %c0_33 = arith.constant 0 : index
      %c0_34 = arith.constant 0 : index
      %44 = vector.load %arg7[%c0_32, %c0_33, %c0_34] : memref<1x8x32xf32, #tpu.memory_space<vmem>>, vector<1x8x32xf32>
      %45 = vector.shape_cast %44 : vector<1x8x32xf32> to vector<8x32xf32>
      %46 = vector.shape_cast %43 : vector<8x32xf32> to vector<1x8x32xf32>
      tpu.vector_store %arg7[%c0_32, %c0_33, %c0_34], %46 {strides = array<i32>} : memref<1x8x32xf32, #tpu.memory_space<vmem>>, vector<1x8x32xf32>,
    } else {
    }
    return
  }
  func.func @transform_0(%arg0: i32, %arg1: i32, %arg2: i32) -> (i32, i32, i32) {
    %c0_i32 = arith.constant 0 : i32
    %c0_i32_0 = arith.constant 0 : i32
    return %arg0, %arg1, %c0_i32 : i32, i32, i32
  }
  func.func @transform_1(%arg0: i32, %arg1: i32, %arg2: i32) -> (i32, i32, i32) {
    %c0_i32 = arith.constant 0 : i32
    %c0_i32_0 = arith.constant 0 : i32
    return %arg0, %arg2, %c0_i32 : i32, i32, i32
  }
  func.func @transform_2(%arg0: i32, %arg1: i32, %arg2: i32) -> (i32, i32, i32) {
    %c0_i32 = arith.constant 0 : i32
    %c0_i32_0 = arith.constant 0 : i32
    return %arg0, %arg2, %c0_i32 : i32, i32, i32
  }
  func.func @transform_3(%arg0: i32, %arg1: i32, %arg2: i32) -> (i32, i32, i32) {
    %c0_i32 = arith.constant 0 : i32
    return %arg0, %arg1, %arg2 : i32, i32, i32
  }
  func.func @transform_4(%arg0: i32, %arg1: i32, %arg2: i32) -> (i32, i32, i32) {
    %c0_i32 = arith.constant 0 : i32
    %c0_i32_0 = arith.constant 0 : i32
    return %arg0, %arg1, %c0_i32 : i32, i32, i32
  }
}

</mosaic_0001>

<bundles_post_ra>
// kernel: tpu_custom_call.1
= control target key start
LH: loop header
LB: loop body
LE: loop exit
PB: predicated region body
PF: predicated region fallthrough
CT: control target
= control target key end

     0   :  { %s1292_s0 = inlined_call_operand.hbm [shape: f32[2,8,32], index: 0, kind: input, shape index: {}]   ;;  %s1293_s1 = inlined_call_operand.hbm [shape: bf16[2,8,32], index: 1, kind: input, shape index: {}]   ;;  %s1294_s2 = inlined_call_operand.hbm [shape: bf16[2,8,32], index: 2, kind: input, shape index: {}]   ;;  %s1295_s3 = inlined_call_operand.vmem [shape: bf16[2,8,8], index: 3, kind: input, shape index: {}]   ;;  %s1296_s4 = inlined_call_operand.hbm [shape: f32[2,8,32], index: 4, kind: output, shape index: {}]  }
   0x1   :  { %1303 = sst [smem:[#allocation20_spill]] %s1293_s1 }
   0x2   :  { %9 = vsyncpa [#allocation7], 0 }
   0x3   :  { %11 = vsyncpa [#allocation7 + $0x1], 0 }
   0x4   :  { %12 = vsyncpa [#allocation10], 0 }
   0x5   :  { %14 = vsyncpa [#allocation10 + $0x1], 0 }
   0x6   :  { %15 = vsyncpa [#allocation8], 0 }
   0x7   :  { %17 = vsyncpa [#allocation8 + $0x1], 0  ;;  %s1010_s15 = smov 0   ;;  %s1012_s16 = smov 0  }
   0x8   :  { %s1014_s17 = smov 0   ;;  %s1016_s18 = smov 0  }
   0x9   :  { %s1018_s19 = smov 0   ;;  %s1020_s20 = smov 0  }
   0xa LB: > { %1304 = sst [smem:[#allocation16_spill]] %s963_s17  ;;  %s1041_s21 = sadd.s32 4294967295, %s975_s20   ;;  %s975_s20 = sphi %s1020_s20, %s23_s20   ;;  %s971_s19 = sphi %s1018_s19, %s1328_s19   ;;  %s967_s18 = sphi %s1016_s18, %s1324_s18   ;;  %s963_s17 = sphi %s1014_s17, %s1323_s17   ;;  %s959_s16 = sphi %s1012_s16, %s1327_s16   ;;  %s955_s15 = sphi %s1010_s15, %s1326_s15  }
   0xb   : > { %1305 = sst [smem:[#allocation17_spill]] %s971_s19  ;;  %s678_s22 = sadd.s32 4294967294, %s975_s20  }
   0xc   : > { %s42_s23 = sadd.s32 1, %s971_s19  ;;  %s51_s24 = sadd.s32 1, %s963_s17 }
   0xd   : > { %p44_p0 = scmp.ge.s32.totalorder %s42_s23, 2  ;;  %p58_p1 = scmp.ne.s32.totalorder %s963_s17, %s959_s16 }
   0xe   : > { %p59_p2 = scmp.eq.s32.totalorder %s975_s20, 0  ;;  %p64_p3 = scmp.ne.s32.totalorder %s959_s16, %s955_s15 }
   0xf   : > { %s1330_s23 = smov (%p44_p0, %s42_s23), 0  ;;  %p65_p5 = scmp.eq.s32.totalorder %s1041_s21, 0 }
  0x10   : > { %1306 = sst [smem:[#allocation18_spill]] %s1330_s23  ;;  %p1053_p4 = por %p59_p2, %p58_p1 }
  0x11   : > { %s46_s26 = ssub.s32 %s971_s19, %s1330_s23  ;;  %p176_p6 = scmp.eq.s32.totalorder %s1041_s21, 1 }
  0x12   : > { %p49_p7 = scmp.eq.s32.totalorder %s46_s26, 0  ;;  %p1061_p8 = por %p65_p5, %p64_p3 }
  0x13   : > { %p1065_p9 = por %p176_p6, %p58_p1  ;;  %p182_p10 = scmp.eq.s32.totalorder %s678_s22, 1 }
  0x14   : > { %s1308_s27 = scalar_select %p1061_p8, 1, 0 }
  0x15   : > { %s1309_s28 = scalar_select %p1065_p9, 1, 0 }
  0x16   : > { %s1070_s29 = scalar_select %p49_p7, %s963_s17, %s51_s24  }
  0x17   : > { %p1072_p11 = por %p182_p10, %p64_p3  ;;  %p737_p13 = scmp.lt.s32.totalorder %s975_s20, 2 }
  0x18   : > { %1310 = sst [smem:[#allocation19_spill]] %s1070_s29  ;;  %s1079_s5 = sand.u32 1, %s963_s17  }
  0x19   : > { %s1311_s30 = scalar_select %p1072_p11, 1, 0 }
  0x1a   : > { %s221_s6 = sand.u32 1, %s975_s20   ;;  %s1298_s7 = sshll.u32 %s1079_s5, 2 }
  0x1b   : > { %p1085_p0 = pnand %p737_p13, %p1053_p4  ;;  %s684_s9 = sshll.u32 %s971_s19, 6 }
  0x1c   : > { %s1313_s1 = sld [smem:[#allocation20_spill]]  ;;  %s225_s13 = scalar_lea.vmem [#allocation9], %s1298_s7 }
  0x1d   : > { %s233_s14 = sshll.u32 %s225_s13, 4  ;;  %s1102_s25 = scalar_lea.hbm %s1294_s2, %s684_s9  ;;  %s1097_s14 = int_to_ptr.vmem [resolvable:$true] %s233_s14 }
  0x1e   : > { %s1104_s26 = scalar_lea.sflag [#allocation10], %s221_s6  ;;  %p1110_p2 = pneg %p1085_p0 }
  0x22   : > { %s1093_s12 = scalar_lea.hbm %s1313_s1, %s684_s9  ;;  %s804_s7 = scalar_lea.hbm %s1313_s1, 128 }
  0x23   : > { %s799_s23 = scalar_lea.hbm %s1093_s12, 64  ;;  %p805_p5 = scmp.lt.u32.totalorder %s1093_s12, %s1313_s1 }
  0x24   : > { %p800_p1 = scmp.ne.s32.totalorder %s1093_s12, %s799_s23  ;;  %p806_p6 = scmp.lt.u32.totalorder %s804_s7, %s799_s23 }
  0x25   : > { %p808_p10 = scmp.lt.u32.totalorder %s799_s23, %s1093_s12 }
  0x26   : > { %p802_p3 = pnand %p1110_p2, %p800_p1  ;;  %p807_p7 = por %p806_p6, %p805_p5 }
  0x28   : > { %p803_p4 = pneg %p802_p3  ;;  %p809_p13 = por %p808_p10, %p807_p7 }
  0x2a   : > { %p810_p12 = pnand %p809_p13, %p803_p4 }
  0x2c   : > { %813 = shalt.err (!%p810_p12)
}
  0x2d   : > { %s814_s6 = scalar_lea.vmem %s1097_s14, 64  ;;  %s977_s24 = smov [#allocation9]  }
  0x2e   : > { %p815_p1 = scmp.ne.s32.totalorder %s1097_s14, %s814_s6  ;;  %s819_s11 = sshll.u32 %s977_s24, 4  ;;  %s820_s11 = int_to_ptr.vmem [resolvable:$false] %s819_s11 }
  0x2f   : > { %s821_s13 = scalar_lea.vmem %s820_s11, 128  ;;  %p822_p9 = scmp.lt.s32.totalorder %s1097_s14, %s820_s11 }
  0x30   : > { %p817_p3 = pnand %p815_p1, %p1110_p2  ;;  %p823_p8 = scmp.lt.s32.totalorder %s821_s13, %s814_s6 }
  0x32   : > { %p818_p11 = pneg %p817_p3  ;;  %p824_p5 = por %p823_p8, %p822_p9 }
  0x34   : > { %p825_p6 = pnand %p824_p5, %p818_p11 }
  0x36   : > { %828 = shalt.err (!%p825_p6)
}
  0x37   : > { %729 = dma.hbm_to_vmem [thread:$0]  (!%p1085_p0), %s1093_s12, 64, %s1097_s14, %s1104_s26  }
  0x38   : > { %p687_p12 = scmp.ge.s32.totalorder %s975_s20, 1  ;;  %p270_p4 = scmp.lt.s32.totalorder %s975_s20, 3 }
  0x39   : > { %s681_s7 = sshll.u32 %s1079_s5, 3  ;;  %s682_s22 = sshll.u32 %s971_s19, 7 }
  0x3a   : > { %p1136_p7 = pnand %p687_p12, %p270_p4  ;;  %s1145_s24 = scalar_lea.hbm %s1292_s0, %s682_s22 }
  0x3b   : > { %s206_s11 = scalar_lea.vmem [#allocation6], %s681_s7  ;;  %s1316_s14 = sshll.u32 %s1079_s5, 2 }
  0x3c   : > { %s1315_s23 = scalar_select %p1136_p7, 1, 0 }
  0x3d   : > { %s214_s12 = sshll.u32 %s206_s11, 4  ;;  %s244_s13 = scalar_lea.vmem [#allocation11], %s1316_s14  ;;  %s1149_s12 = int_to_ptr.vmem [resolvable:$true] %s214_s12 }
  0x3e   : > { %s252_s1 = sshll.u32 %s244_s13, 4  ;;  %s203_s29 = scalar_lea.sflag [#allocation7], %s1079_s5  ;;  %s1151_s1 = int_to_ptr.vmem [resolvable:$true] %s252_s1 }
  0x3f   : > { %s829_s19 = scalar_lea.hbm %s1145_s24, 128  ;;  %s834_s6 = scalar_lea.hbm %s1292_s0, 256 }
  0x40   : > { %p830_p8 = scmp.ne.s32.totalorder %s1145_s24, %s829_s19  ;;  %p835_p10 = scmp.lt.u32.totalorder %s1145_s24, %s1292_s0 }
  0x41   : > { %p836_p13 = scmp.lt.u32.totalorder %s834_s6, %s829_s19  ;;  %p838_p3 = scmp.lt.u32.totalorder %s829_s19, %s1145_s24 }
  0x42   : > { %p832_p9 = pnand %p830_p8, %p1110_p2 }
  0x43   : > { %p837_p1 = por %p836_p13, %p835_p10 }
  0x44   : > { %p833_p11 = pneg %p832_p9 }
  0x45   : > { %p839_p5 = por %p838_p3, %p837_p1 }
  0x47   : > { %p840_p6 = pnand %p839_p5, %p833_p11 }
  0x49   : > { %843 = shalt.err (!%p840_p6)
}
  0x4a   : > { %s844_s5 = scalar_lea.vmem %s1149_s12, 128  ;;  %s978_s11 = smov [#allocation6]  }
  0x4b   : > { %p845_p12 = scmp.ne.s32.totalorder %s1149_s12, %s844_s5  ;;  %s849_s14 = sshll.u32 %s978_s11, 4  ;;  %s850_s14 = int_to_ptr.vmem [resolvable:$false] %s849_s14 }
  0x4c   : > { %s851_s17 = scalar_lea.vmem %s850_s14, 256  ;;  %p852_p9 = scmp.lt.s32.totalorder %s1149_s12, %s850_s14 }
  0x4d   : > { %p847_p4 = pnand %p845_p12, %p1110_p2  ;;  %p853_p7 = scmp.lt.s32.totalorder %s851_s17, %s844_s5 }
  0x4f   : > { %p848_p8 = pneg %p847_p4  ;;  %p854_p10 = por %p853_p7, %p852_p9 }
  0x51   : > { %p855_p13 = pnand %p854_p10, %p848_p8 }
  0x53   : > { %858 = shalt.err (!%p855_p13)
}
  0x54   : > { %726 = dma.hbm_to_vmem [thread:$0]  (!%p1085_p0), %s1145_s24, 128, %s1149_s12, %s203_s29  }
  0x55   : > { %s859_s19 = scalar_lea.hbm %s1102_s25, 64  ;;  %s864_s9 = scalar_lea.hbm %s1294_s2, 128 }
  0x56   : > { %p860_p11 = scmp.ne.s32.totalorder %s1102_s25, %s859_s19  ;;  %p865_p7 = scmp.lt.u32.totalorder %s1102_s25, %s1294_s2 }
  0x57   : > { %p866_p5 = scmp.lt.u32.totalorder %s864_s9, %s859_s19  ;;  %p868_p12 = scmp.lt.u32.totalorder %s859_s19, %s1102_s25 }
  0x58   : > { %p862_p1 = pnand %p860_p11, %p1110_p2 }
  0x59   : > { %p867_p6 = por %p866_p5, %p865_p7 }
  0x5a   : > { %p863_p3 = pneg %p862_p1 }
  0x5b   : > { %p869_p4 = por %p868_p12, %p867_p6 }
  0x5d   : > { %p870_p8 = pnand %p869_p4, %p863_p3 }
  0x5f   : > { %873 = shalt.err (!%p870_p8)
}
  0x60   : > { %s874_s29 = scalar_lea.vmem %s1151_s1, 64  ;;  %s979_s24 = smov [#allocation11]  }
  0x61   : > { %p875_p9 = scmp.ne.s32.totalorder %s1151_s1, %s874_s29  ;;  %s879_s12 = sshll.u32 %s979_s24, 4  ;;  %s880_s12 = int_to_ptr.vmem [resolvable:$false] %s879_s12 }
  0x62   : > { %s881_s5 = scalar_lea.vmem %s880_s12, 128  ;;  %p882_p11 = scmp.lt.s32.totalorder %s1151_s1, %s880_s12 }
  0x63   : > { %p877_p10 = pnand %p875_p9, %p1110_p2  ;;  %p883_p1 = scmp.lt.s32.totalorder %s881_s5, %s874_s29 }
  0x65   : > { %p878_p13 = pneg %p877_p10  ;;  %p884_p7 = por %p883_p1, %p882_p11 }
  0x67   : > { %p885_p5 = pnand %p884_p7, %p878_p13 }
  0x69   : > { %888 = shalt.err (!%p885_p5)
}
  0x6a   : > { %732 = dma.hbm_to_vmem [thread:$0]  (!%p1085_p0), %s1102_s25, 64, %s1151_s1, %s1104_s26  }
  0x6b   : > { %p1317_p3 = scmp.ne.s32.totalorder %s1315_s23, 0 }
  0x6c   : > { %s1200_s10 = sand.u32 (!%p1317_p3), 1, %s959_s16   ;;  %p1318_p2 = scmp.ne.s32.totalorder (!%p1317_p3), %s1308_s27, 0 }
  0x6d   : > { %274 = sbr.rel (%p1317_p3) target bundleno = 944 (0x3b0), region = 36  ;;  %s688_s11 = sshll.u32 (!%p1317_p3), %s1200_s10, 3 }
  0x6e   : > { %s277_s14 = scalar_lea.sflag (!%p1317_p3), [#allocation7], %s1200_s10  ;;  %s280_s17 = scalar_lea.vmem (!%p1317_p3), [#allocation6], %s688_s11 }
  0x74   : > { %942 = dma.done.wait (%p1318_p2), %s277_s14, 128  }
  0x75   : > { %944 = vsyncadd (%p1318_p2), %s277_s14, 4294967168  ;;  %s285_s1 = sand.u32 1, %s1041_s21   ;;  %s689_s8 = sshll.u32 %s1200_s10, 2 }
  0x76   : > { %s286_s25 = scalar_lea.sflag [#allocation10], %s285_s1  ;;  %s289_s26 = scalar_lea.vmem [#allocation9], %s689_s8 }
  0x77   : > { %946 = dma.done.wait (%p1318_p2), %s286_s25, 128  }
  0x78   : > { %948 = vsyncadd (%p1318_p2), %s286_s25, 4294967168  ;;  %vm366_vm0 = vcmask 261120   ;;  %v980_v0 = vmov 0.0   ;;  %vm981_vm1 = vmmov 0   ;;  %v369_v1 = vld [vmem:[%s289_s26] sm:$0xf] }
  0x79   : > { %703 = vmatprep.subr.bf16.mxu0 %v980_v0  ;;  %367 = vst.msk [vmem:[#allocation5] sm:$0xff] %vm366_vm0, %v980_v0  ;;  %705 = vmatprep.mubr.msk.bf16.mxu0 %vm981_vm1, %v980_v0  ;;  %v358_v2 = vld [vmem:[%s280_s17] sm:$0xff]  ;;  %v377_v3 = vsel %vm366_vm0, %v369_v1, 0  ;;  %vm361_vm2 = vcmask 257024   ;;  %vm363_vm3 = vcmask 7168   ;;  %p343_p0 = scmp.lt.s32.totalorder %s967_s18, 1 }
  0x7a   : > { %709 = vmatprep.subr.bf16.mxu1 %v980_v0  ;;  %711 = vmatprep.mubr.msk.bf16.mxu1 %vm981_vm1, %v980_v0  ;;  %v359_v4 = vmul.f32 0.17677669, %v358_v2  ;;  %v982_v7 = vmov -1e+30   ;;  %365 = vst.msk [vmem:[#allocation4] sm:$0xff] %vm363_vm3, %v980_v0  ;;  %vm420_vm4 = vcmask 64512  }
  0x7b   : > { %704 = vmatpush3.bf16.xpose.msra.mxu0 %v377_v3  ;;  %364 = vst.msk [vmem:[#allocation3] sm:$0xff] %vm363_vm3, %v982_v7  ;;  %s344_s21 = scalar_select %p343_p0, %s967_s18, 1  ;;  %v983_v16 = vmov 0   ;;  %vm456_vm5 = vcmask 1043456  }
  0x7c   : > { %v360_v5 = vpack.c.bf16 %v359_v4, %v359_v4  ;;  %791 = vset.pattern.permute.xlu0 %v983_v16  ;;  %792 = vset.pattern.permute.xlu1 %v983_v16  ;;  %s298_s22 = scalar_lea.vmem [#allocation11], %s689_s8  ;;  %s696_s9 = sshll.u32 %s967_s18, 7 }
  0x7d   : > { %s692_s27 = sshll.u32 %s344_s21, 2  ;;  %v452_v21 = vld [vmem:[%s298_s22] sm:$0xf]  ;;  %s342_s6 = scalar_lea.vmem [#allocation12], %s688_s11 }
  0x7e   : > { %362 = vst.msk [vmem:[#allocation2] sm:$0xf] %vm361_vm2, %v360_v5  ;;  %s352_s13 = scalar_lea.vmem %s1295_s3, %s692_s27  ;;  %v458_v22 = vsel %vm456_vm5, %v452_v21, 0  ;;  %s531_s7 = sshll.u32 %s342_s6, 4  ;;  %s1244_s7 = int_to_ptr.vmem [resolvable:$true] %s531_s7 }
  0x7f   : > { %v370_v8 = vld [vmem:[%s352_s13] sm:$0xf]  ;;  %710 = vmatpush3.bf16.msra.mxu1 %v458_v22  ;;  %s1242_s12 = scalar_lea.hbm %s1296_s4, %s696_s9  ;;  %s517_s5 = scalar_lea.sflag [#allocation8], %s1200_s10 }
  0x80   : > { %v371_v9 = vunpack.c.l.bf16 %v370_v8  ;;  %v444_v37 = vld [vmem:[#allocation5] sm:$0xff]  ;;  %s889_s18 = scalar_lea.vmem %s1244_s7, 128  ;;  %p1319_p12 = scmp.ne.s32.totalorder %s1309_s28, 0 }
  0x81   : > { %v436_v31 = vld [vmem:[#allocation4] sm:$0xff]  ;;  %p890_p6 = scmp.ne.s32.totalorder %s1244_s7, %s889_s18  ;;  %s984_s11 = smov [#allocation12]  }
  0x82   : > { %v419_v17 = vld [vmem:[#allocation3] sm:$0xff]  ;;  %s893_s14 = sshll.u32 %s984_s11, 4  ;;  %s894_s14 = int_to_ptr.vmem [resolvable:$false] %s893_s14 }
  0x83   : > { %p891_p4 = pnand %p890_p6, %p1319_p12  ;;  %s895_s17 = scalar_lea.vmem %s894_s14, 256 }
  0x84   : > { %p896_p9 = scmp.lt.s32.totalorder %s1244_s7, %s894_s14  ;;  %p897_p10 = scmp.lt.s32.totalorder %s895_s17, %s889_s18 }
  0x85   : > { %v368_v6 = vld [vmem:[#allocation2] sm:$0xf]  ;;  %p892_p8 = pneg %p891_p4 }
  0x86   : > { %706 = vmatmul.mubr.msk.bf16.vlgmr.msra.gmra.mrb[0].mxu0 %vm366_vm0, %v368_v6  ;;  %p898_p13 = por %p897_p10, %p896_p9 }
  0x88   : > { %p899_p11 = pnand %p898_p13, %p892_p8 }
 0x159   : > { %v413_v10 = vpop.f32.mrb[0].mxu0 }
 0x15a   : > { %v414_v11 = vadd.f32 %v413_v10, %v371_v9  ;;  %v707_v12 = vpop.f32.mrb[1].mxu0 }
 0x15b   : > { %v416_v13 = vpop.f32.mrb[2].mxu0 }
 0x15c   : > { %v708_v14 = vpop.f32.mrb[3].mxu0  ;;  %v421_v15 = vsel %vm420_vm4, %v414_v11, -inf }
 0x15d   : > { %422 = vmax.xlane.f32.xlu0 %v421_v15 }
 0x1ea   : > { %v423_v18 = vpop.xlane.xlu0 %422 }
 0x1eb   : > { %v424_v19 = vmax.f32 %v419_v17, %v423_v18 }
 0x1ed   : > { %v425_v20 = vsub.f32 %v419_v17, %v424_v19  ;;  %502 = vst.msk [vmem:[#allocation3] sm:$0xff] %vm363_vm3, %v424_v19  ;;  %430 = vperm.xlu0 %791, %v424_v19  }
 0x1ef   : > { %v426_v29 = vmul.f32 1.442695, %v425_v20 }
 0x26c   : > { %v431_v23 = vpop.permute.xlu0 %430 }
 0x26d   : > { %v433_v24 = vsub.f32 %v414_v11, %v431_v23 }
 0x26f   : > { %v434_v25 = vmul.f32 1.442695, %v433_v24 }
 0x271   : > { %793 = vpow2.f32 %v434_v25 }
 0x272   : > { %795 = vpow2.f32 %v426_v29 }
 0x27b   : > { %v794_v26 = vpop.eup %793 }
 0x27c   : > { %v438_v27 = vsel %vm420_vm4, %v794_v26, 0.0  ;;  %v451_v28 = vpack.c.bf16 %v794_v26, %v794_v26  ;;  %v796_v30 = vpop.eup %795 }
 0x27d   : > { %439 = vadd.xlane.f32.xlu1 %v438_v27  ;;  %v437_v32 = vmul.f32 %v796_v30, %v436_v31 }
 0x27e   : > { %712 = vmatmul.mubr.msk.bf16.vlgmr.msra.gmra.mrb[0].mxu1 %vm420_vm4, %v451_v28 }
 0x28e   : > { %447 = vperm.xlu1 %792, %v796_v30  }
 0x30a   : > { %v440_v33 = vpop.xlane.xlu1 %439 }
 0x30b   : > { %v441_v34 = vadd.f32 %v440_v33, %v437_v32 }
 0x30d   : > { %443 = vst.msk [vmem:[#allocation4] sm:$0xff] %vm363_vm3, %v441_v34 }
 0x30e   : > { %v448_v38 = vpop.permute.xlu1 %447 }
 0x30f   : > { %v450_v39 = vmul.f32 %v448_v38, %v444_v37 }
 0x314   : > { %v506_v35 = vld [vmem:[#allocation4] sm:$0xff] }
 0x315   : > { %797 = vrcp.f32 %v506_v35 }
 0x31f   : > { %v798_v36 = vpop.eup %797 }
 0x320   : > { %511 = vperm.xlu1 %792, %v798_v36  }
 0x351   : > { %v494_v40 = vpop.f32.mrb[0].mxu1 }
 0x352   : > { %v500_v41 = vadd.f32 %v494_v40, %v450_v39  ;;  %v713_v42 = vpop.f32.mrb[1].mxu1 }
 0x353   : > { %v497_v43 = vpop.f32.mrb[2].mxu1 }
 0x354   : > { %501 = vst.msk [vmem:[#allocation5] sm:$0xff] %vm366_vm0, %v500_v41  ;;  %v714_v44 = vpop.f32.mrb[3].mxu1 }
 0x35b   : > { %v508_v45 = vld [vmem:[#allocation5] sm:$0xff] }
 0x39f   : > { %v512_v46 = vpop.permute.xlu1 %511 }
 0x3a0   : > { %v514_v47 = vmul.f32 %v512_v46, %v508_v45 }
 0x3a2   : > { %515 = vst.msk [vmem:[%s342_s6] sm:$0xff] %vm366_vm0, %v514_v47 }
 0x3a3   : > { %902 = shalt.err (!%p899_p11)
}
 0x3a4   : > { %s903_s10 = scalar_lea.hbm %s1242_s12, 128  ;;  %s907_s25 = scalar_lea.hbm %s1296_s4, 256 }
 0x3a5   : > { %p904_p1 = scmp.ne.s32.totalorder %s1242_s12, %s903_s10  ;;  %p908_p3 = scmp.lt.u32.totalorder %s1242_s12, %s1296_s4 }
 0x3a6   : > { %p909_p2 = scmp.lt.u32.totalorder %s907_s25, %s903_s10  ;;  %p911_p6 = scmp.lt.u32.totalorder %s903_s10, %s1242_s12 }
 0x3a7   : > { %p905_p7 = pnand %p904_p1, %p1319_p12 }
 0x3a8   : > { %p910_p0 = por %p909_p2, %p908_p3 }
 0x3a9   : > { %p906_p5 = pneg %p905_p7 }
 0x3aa   : > { %p912_p4 = por %p911_p6, %p910_p0 }
 0x3ac   : > { %p913_p8 = pnand %p912_p4, %p906_p5 }
 0x3ae   : > { %916 = shalt.err (!%p913_p8)
}
 0x3af   : > { %721 = dma.vmem_to_hbm [thread:$0]  (%p1319_p12), %s1244_s7, 128, %s1242_s12, %s517_s5  }
 0x3b0 PF: > { %s543_s27 = sand.u32 1, %s955_s15   ;;  %p1320_p9 = scmp.ne.s32.totalorder %s1311_s30, 0 }
 0x3b1   : > { %p1321_p10 = scmp.ge.s32.totalorder %s975_s20, 2  ;;  %s544_s23 = scalar_lea.sflag [#allocation8], %s543_s27 }
 0x3b3   : > { %p734_p13 = pnand %p1321_p10, %p1320_p9 }
 0x3b5   : > { %950 = dma.done.wait (!%p734_p13), %s544_s23, 128  }
 0x3b6   : > { %952 = vsyncadd (!%p734_p13), %s544_s23, 4294967168  ;;  %s23_s20 = sadd.s32 1, %s975_s20   ;;  %s1322_s19 = sld [smem:[#allocation16_spill]] }
 0x3b7   : > { %p20_p11 = scmp.ge.s32.totalorder %s23_s20, 4   ;;  %s1323_s17 = sld [smem:[#allocation19_spill]] }
 0x3b8   : > { %s1324_s18 = sld [smem:[#allocation17_spill]]  ;;  %s1325_s28 = sld [smem:[#allocation18_spill]] }
 0x3b9   : > { %s1326_s15 = smov %s959_s16  ;;  %22 = sbr.rel (!%p20_p11) target bundleno = 10 (0xa), region = 116 }
 0x3bc   : > { %s1327_s16 = smov %s1322_s19 }
 0x3be   : > { %s1328_s19 = smov %s1325_s28 }
 0x3c0   :  { %549 = vsyncpa [#allocation7], 1 }
 0x3c1   :  { %551 = vsyncpa [#allocation7 + $0x1], 1 }
 0x3c2   :  { %552 = vsyncpa [#allocation10], 1 }
 0x3c3   :  { %554 = vsyncpa [#allocation10 + $0x1], 1 }
 0x3c4   :  { %555 = vsyncpa [#allocation8], 1 }
 0x3c5   :  { %557 = vsyncpa [#allocation8 + $0x1], 1 }

</bundles_post_ra>
